<compile_context>
chip_gen: v6e
topology: v6e:2x2x1
jax: 0.10.0
libtpu: 0.0.40
codegen_flags: <defaults>
</compile_context>

<pallas_src>
import functools

import jax
import jax.numpy as jnp
from jax.experimental import pallas as pl
from jax.experimental.pallas import tpu as pltpu


def _round_up(x, m):
    return ((x + m - 1) // m) * m


# ----------------------------------------------------------------------------
# Pallas kernel: fused  sigmoid(Wo @ relu(Wg@g + Ws@s + b1) + bo) * s  per pixel
# ----------------------------------------------------------------------------
def _attention_gate_kernel(g_ref, s_ref,
                           wg_ref, ws_ref, wo_ref,
                           b1_ref, bo_ref,
                           out_ref):
    g = g_ref[...]                                  # (C, tp), input dtype
    s = s_ref[...]                                  # (C, tp), input dtype

    # Wg(g) + Ws(s) + combined folded-BN bias: MXU dots with f32 accumulation.
    # Inputs are fed in their native dtype (bf16 stays bf16 on the MXU).
    a = jnp.dot(wg_ref[...], g, preferred_element_type=jnp.float32)
    b = jnp.dot(ws_ref[...], s, preferred_element_type=jnp.float32)
    h = jnp.maximum(a + b + b1_ref[...], 0.0)       # (C, tp), f32

    # Output 1x1 conv + sigmoid.  Feed the MXU in the weights' dtype; keep the
    # epilogue in f32 (safe on v5e which has no bf16 VPU/EUP path).
    o = jnp.dot(wo_ref[...], h.astype(wo_ref.dtype),
                preferred_element_type=jnp.float32) + bo_ref[...]
    att = jax.nn.sigmoid(o)

    # Gate the skip connection.
    out_ref[...] = (att * s.astype(jnp.float32)).astype(out_ref.dtype)


def _choose_pixel_tile(n_batch, P, C, itemsize):
    """Largest lane-dense pixel tile whose double-buffered pipeline fits a
    conservative VMEM budget (stays under 48 MiB => safe on v7x's 64 MiB)."""
    c_pad = _round_up(C, 8)                         # sublane padding
    c_lane = _round_up(C, 128)                      # lane padding of weights
    # weights (3x CxC) + biases (2x Cx1), allocated double-buffered by Pallas.
    resident = 2 * (3 * c_pad * c_lane + 2 * c_pad * 128) * 4
    budget = (44 << 20) - resident
    per_col = 3 * 2 * c_pad * itemsize              # g, s, out tiles, 2 buffers
    tp = min(2048, _round_up(P, 128),
             max(128, (budget // per_col) // 128 * 128))
    # Keep >= 2 grid steps so both TensorCores on v7x get work.
    if n_batch * ((P + tp - 1) // tp) < 2 and P > 128:
        tp = max(128, _round_up((P + 1) // 2, 128))
    return tp


@functools.partial(jax.jit, static_argnames=("tp",))
def attention_gate_pallas(g, s, params, *, tp=None):
    """g, s: NCHW tensors with C == inc == outc.  Returns sigmoid(...) * s."""
    N, C, H, W = g.shape
    P = H * W

    wg, ws, wo, b1, bo = params       # wg/ws/wo: (Cout, Cin); b1/bo: (Cout, 1)
    Cout = wg.shape[0]
    assert Cout == C, "out * s requires outc == inc"

    itemsize = jnp.dtype(g.dtype).itemsize
    if tp is None:
        tp = _choose_pixel_tile(N, P, C, itemsize)

    # NCHW -> (N, C, P): contiguous reshape, no transpose / extra HBM pass.
    g3 = g.reshape(N, C, P)
    s3 = s.reshape(N, C, P)

    # Tail pixel tile (P % tp != 0) is handled by Pallas: per-column math only,
    # so out-of-bounds lanes never contaminate valid columns and their stores
    # are dropped.
    grid = (N, pl.cdiv(P, tp))

    row_spec = pl.BlockSpec((None, C, tp), lambda n, j: (n, 0, j))
    mat_spec = pl.BlockSpec((C, C), lambda n, j: (0, 0))
    bias_spec = pl.BlockSpec((C, 1), lambda n, j: (0, 0))

    cost = pl.CostEstimate(
        flops=3 * 2 * N * P * C * C,                 # three CxC matmuls / pixel
        transcendentals=N * P * C,                   # sigmoid
        bytes_accessed=3 * N * C * P * itemsize + 3 * C * C * 4 + 2 * C * 4,
    )

    out3 = pl.pallas_call(
        _attention_gate_kernel,
        out_shape=jax.ShapeDtypeStruct((N, C, P), s.dtype),
        grid_spec=pltpu.PrefetchScalarGridSpec(
            num_scalar_prefetch=0,
            grid=grid,
            in_specs=[row_spec, row_spec,
                      mat_spec, mat_spec, mat_spec,
                      bias_spec, bias_spec],
            out_specs=row_spec,
        ),
        compiler_params=pltpu.CompilerParams(
            dimension_semantics=("parallel", "parallel"),
            # Tile chooser keeps the pipeline under ~44 MiB; 48 MiB limit is
            # safe on v5e/v6e (128 MiB) and v7x (64 MiB physical).
            vmem_limit_bytes=48 * 1024 * 1024,
        ),
        cost_estimate=cost,
    )(g3, s3, wg, ws, wo, b1, bo)

    return out3.reshape(N, C, H, W)


# ----------------------------------------------------------------------------
# Deterministic parameter construction (conv + eval-mode BN folded together)
# ----------------------------------------------------------------------------
def make_params(key, inc, outc, eps=1e-5):
    ks = jax.random.split(key, 12)

    def conv_bn(kw, kb, kgamma, kbeta, kmean, kvar):
        w = 0.1 * jax.random.normal(kw, (outc, inc), jnp.float32)   # (O, I)
        b = 0.1 * jax.random.normal(kb, (outc,), jnp.float32)
        gamma = 1.0 + 0.05 * jax.random.normal(kgamma, (outc,), jnp.float32)
        beta = 0.05 * jax.random.normal(kbeta, (outc,), jnp.float32)
        mean = 0.05 * jax.random.normal(kmean, (outc,), jnp.float32)
        var = jnp.abs(1.0 + 0.05 * jax.random.normal(kvar, (outc,), jnp.float32))
        scale = gamma / jnp.sqrt(var + eps)
        w_f = w * scale[:, None]                 # folded weight (O, I)
        b_f = (b - mean) * scale + beta          # folded bias   (O,)
        return w_f, b_f

    wg, bg = conv_bn(*ks[0:6])
    ws, bs = conv_bn(*ks[6:12])

    ko = jax.random.split(jax.random.fold_in(key, 7), 2)
    wo = 0.1 * jax.random.normal(ko[0], (outc, outc), jnp.float32)
    bo = 0.1 * jax.random.normal(ko[1], (outc,), jnp.float32)

    b1 = (bg + bs)[:, None]                      # combined Wg/Ws bias (O, 1)
    return (wg, ws, wo, b1, bo[:, None])


# Pure-JAX reference of the same (eval-mode-BN) forward pass, for sanity check.
def reference(g, s, params):
    wg, ws, wo, b1, bo = params
    N, C, H, W = g.shape
    g2 = g.reshape(N, C, H * W)
    s2 = s.reshape(N, C, H * W)
    h = jnp.maximum(jnp.einsum("oi,nip->nop", wg, g2)
                    + jnp.einsum("oi,nip->nop", ws, s2) + b1, 0.0)
    att = jax.nn.sigmoid(jnp.einsum("oc,ncp->nop", wo, h) + bo)
    return (att * s2).reshape(N, C, H, W)


if __name__ == "__main__":
    key = jax.random.PRNGKey(0)
    kg, ks_, kp = jax.random.split(key, 3)

    N, C, H, W = 2, 4, 16, 16          # inc == outc == 4
    g = jax.random.normal(kg, (N, C, H, W), jnp.float32)
    s = jax.random.normal(ks_, (N, C, H, W), jnp.float32)
    params = make_params(kp, C, C)

    out = attention_gate_pallas(g, s, params)
    out = jax.block_until_ready(out)

    ref = reference(g, s, params)
    assert out.shape == (N, C, H, W)
    assert jnp.allclose(out, ref, atol=1e-5, rtol=1e-5)

    print("KERNEL_OK")
</pallas_src>

<mosaic_0001>
module attributes {stable_mosaic.version = 11 : i64} {
  func.func @_attention_gate_kernel(%arg0: i32, %arg1: i32, %arg2: memref<1x4x256xf32, #tpu.memory_space<vmem>>, %arg3: memref<1x4x256xf32, #tpu.memory_space<vmem>>, %arg4: memref<4x4xf32, #tpu.memory_space<vmem>>, %arg5: memref<4x4xf32, #tpu.memory_space<vmem>>, %arg6: memref<4x4xf32, #tpu.memory_space<vmem>>, %arg7: memref<4x1xf32, #tpu.memory_space<vmem>>, %arg8: memref<4x1xf32, #tpu.memory_space<vmem>>, %arg9: memref<1x4x256xf32, #tpu.memory_space<vmem>>) attributes {dimension_semantics = [#tpu.dimension_semantics<parallel>, #tpu.dimension_semantics<parallel>], iteration_bounds = array<i64: 2, 1>, scalar_prefetch = 0 : i64, scratch_operands = 0 : i64, tpu.core_type = #tpu.core_type<tc>, window_params = [{transform_indices = @transform_0, window_bounds = array<i64: 1, 4, 256>}, {transform_indices = @transform_1, window_bounds = array<i64: 1, 4, 256>}, {pipeline_mode = #tpu.pipeline_mode<synchronous>, transform_indices = @transform_2, window_bounds = array<i64: 4, 4>}, {pipeline_mode = #tpu.pipeline_mode<synchronous>, transform_indices = @transform_3, window_bounds = array<i64: 4, 4>}, {pipeline_mode = #tpu.pipeline_mode<synchronous>, transform_indices = @transform_4, window_bounds = array<i64: 4, 4>}, {pipeline_mode = #tpu.pipeline_mode<synchronous>, transform_indices = @transform_5, window_bounds = array<i64: 4, 1>}, {pipeline_mode = #tpu.pipeline_mode<synchronous>, transform_indices = @transform_6, window_bounds = array<i64: 4, 1>}, {transform_indices = @transform_7, window_bounds = array<i64: 1, 4, 256>}]} {
    %c0 = arith.constant 0 : index
    %c0_0 = arith.constant 0 : index
    %c0_1 = arith.constant 0 : index
    %0 = vector.load %arg2[%c0, %c0_0, %c0_1] : memref<1x4x256xf32, #tpu.memory_space<vmem>>, vector<1x4x256xf32>
    %1 = vector.shape_cast %0 : vector<1x4x256xf32> to vector<4x256xf32>
    %c0_2 = arith.constant 0 : index
    %c0_3 = arith.constant 0 : index
    %c0_4 = arith.constant 0 : index
    %2 = vector.load %arg3[%c0_2, %c0_3, %c0_4] : memref<1x4x256xf32, #tpu.memory_space<vmem>>, vector<1x4x256xf32>
    %3 = vector.shape_cast %2 : vector<1x4x256xf32> to vector<4x256xf32>
    %c0_5 = arith.constant 0 : index
    %c0_6 = arith.constant 0 : index
    %4 = vector.load %arg4[%c0_5, %c0_6] : memref<4x4xf32, #tpu.memory_space<vmem>>, vector<4x4xf32>
    %cst = arith.constant dense<0.000000e+00> : vector<4x256xf32>
    %5 = tpu.matmul %4, %1, %cst {dimension_numbers = #tpu.dot_dimension_numbers<[1], [0], [0], [1], [0, 0, 1, 1], [], []>} : vector<4x4xf32>, vector<4x256xf32>, vector<4x256xf32> -> vector<4x256xf32>
    %c0_7 = arith.constant 0 : index
    %c0_8 = arith.constant 0 : index
    %6 = vector.load %arg5[%c0_7, %c0_8] : memref<4x4xf32, #tpu.memory_space<vmem>>, vector<4x4xf32>
    %cst_9 = arith.constant dense<0.000000e+00> : vector<4x256xf32>
    %7 = tpu.matmul %6, %3, %cst_9 {dimension_numbers = #tpu.dot_dimension_numbers<[1], [0], [0], [1], [0, 0, 1, 1], [], []>} : vector<4x4xf32>, vector<4x256xf32>, vector<4x256xf32> -> vector<4x256xf32>
    %8 = arith.addf %5, %7 : vector<4x256xf32>
    %c0_10 = arith.constant 0 : index
    %c0_11 = arith.constant 0 : index
    %9 = vector.load %arg7[%c0_10, %c0_11] : memref<4x1xf32, #tpu.memory_space<vmem>>, vector<4x1xf32>
    %10 = vector.broadcast %9 : vector<4x1xf32> to vector<4x256xf32>
    %11 = arith.addf %8, %10 : vector<4x256xf32>
    %cst_12 = arith.constant 0.000000e+00 : f32
    %12 = vector.broadcast %cst_12 : f32 to vector<4x256xf32>
    %13 = arith.maximumf %11, %12 : vector<4x256xf32>
    %c0_13 = arith.constant 0 : index
    %c0_14 = arith.constant 0 : index
    %14 = vector.load %arg6[%c0_13, %c0_14] : memref<4x4xf32, #tpu.memory_space<vmem>>, vector<4x4xf32>
    %cst_15 = arith.constant dense<0.000000e+00> : vector<4x256xf32>
    %15 = tpu.matmul %14, %13, %cst_15 {dimension_numbers = #tpu.dot_dimension_numbers<[1], [0], [0], [1], [0, 0, 1, 1], [], []>} : vector<4x4xf32>, vector<4x256xf32>, vector<4x256xf32> -> vector<4x256xf32>
    %c0_16 = arith.constant 0 : index
    %c0_17 = arith.constant 0 : index
    %16 = vector.load %arg8[%c0_16, %c0_17] : memref<4x1xf32, #tpu.memory_space<vmem>>, vector<4x1xf32>
    %17 = vector.broadcast %16 : vector<4x1xf32> to vector<4x256xf32>
    %18 = arith.addf %15, %17 : vector<4x256xf32>
    %19 = arith.negf %18 : vector<4x256xf32>
    %20 = math.exp %19 : vector<4x256xf32>
    %cst_18 = arith.constant 1.000000e+00 : f32
    %21 = vector.broadcast %cst_18 : f32 to vector<4x256xf32>
    %22 = arith.addf %21, %20 : vector<4x256xf32>
    %23 = arith.divf %21, %22 : vector<4x256xf32>
    %24 = arith.mulf %23, %3 : vector<4x256xf32>
    %c0_19 = arith.constant 0 : index
    %c0_20 = arith.constant 0 : index
    %c0_21 = arith.constant 0 : index
    %25 = vector.load %arg9[%c0_19, %c0_20, %c0_21] : memref<1x4x256xf32, #tpu.memory_space<vmem>>, vector<1x4x256xf32>
    %26 = vector.shape_cast %25 : vector<1x4x256xf32> to vector<4x256xf32>
    %27 = vector.shape_cast %24 : vector<4x256xf32> to vector<1x4x256xf32>
    tpu.vector_store %arg9[%c0_19, %c0_20, %c0_21], %27 {strides = array<i32>} : memref<1x4x256xf32, #tpu.memory_space<vmem>>, vector<1x4x256xf32>,
    return
  }
  func.func @transform_0(%arg0: i32, %arg1: i32) -> (i32, i32, i32) {
    %c0_i32 = arith.constant 0 : i32
    %c0_i32_0 = arith.constant 0 : i32
    return %arg0, %c0_i32, %arg1 : i32, i32, i32
  }
  func.func @transform_1(%arg0: i32, %arg1: i32) -> (i32, i32, i32) {
    %c0_i32 = arith.constant 0 : i32
    %c0_i32_0 = arith.constant 0 : i32
    return %arg0, %c0_i32, %arg1 : i32, i32, i32
  }
  func.func @transform_2(%arg0: i32, %arg1: i32) -> (i32, i32) {
    %c0_i32 = arith.constant 0 : i32
    %c0_i32_0 = arith.constant 0 : i32
    %c0_i32_1 = arith.constant 0 : i32
    return %c0_i32, %c0_i32_0 : i32, i32
  }
  func.func @transform_3(%arg0: i32, %arg1: i32) -> (i32, i32) {
    %c0_i32 = arith.constant 0 : i32
    %c0_i32_0 = arith.constant 0 : i32
    %c0_i32_1 = arith.constant 0 : i32
    return %c0_i32, %c0_i32_0 : i32, i32
  }
  func.func @transform_4(%arg0: i32, %arg1: i32) -> (i32, i32) {
    %c0_i32 = arith.constant 0 : i32
    %c0_i32_0 = arith.constant 0 : i32
    %c0_i32_1 = arith.constant 0 : i32
    return %c0_i32, %c0_i32_0 : i32, i32
  }
  func.func @transform_5(%arg0: i32, %arg1: i32) -> (i32, i32) {
    %c0_i32 = arith.constant 0 : i32
    %c0_i32_0 = arith.constant 0 : i32
    %c0_i32_1 = arith.constant 0 : i32
    return %c0_i32, %c0_i32_0 : i32, i32
  }
  func.func @transform_6(%arg0: i32, %arg1: i32) -> (i32, i32) {
    %c0_i32 = arith.constant 0 : i32
    %c0_i32_0 = arith.constant 0 : i32
    %c0_i32_1 = arith.constant 0 : i32
    return %c0_i32, %c0_i32_0 : i32, i32
  }
  func.func @transform_7(%arg0: i32, %arg1: i32) -> (i32, i32, i32) {
    %c0_i32 = arith.constant 0 : i32
    %c0_i32_0 = arith.constant 0 : i32
    return %arg0, %c0_i32, %arg1 : i32, i32, i32
  }
}

</mosaic_0001>

<bundles_post_ra>
// kernel: attention_gate_pallas.1
= control target key start
LH: loop header
LB: loop body
LE: loop exit
PB: predicated region body
PF: predicated region fallthrough
CT: control target
= control target key end

     0   :  { %s872_s24 = smov 0   ;;  %s874_s25 = smov 0   ;;  %s937_s0 = inlined_call_operand.vmem [shape: f32[2,4,256], index: 0, kind: input, shape index: {}]   ;;  %s938_s1 = inlined_call_operand.vmem [shape: f32[2,4,256], index: 1, kind: input, shape index: {}]   ;;  %s939_s2 = inlined_call_operand.vmem [shape: f32[4,4], index: 2, kind: input, shape index: {}]   ;;  %s940_s3 = inlined_call_operand.vmem [shape: f32[4,4], index: 3, kind: input, shape index: {}]   ;;  %s941_s4 = inlined_call_operand.vmem [shape: f32[4,4], index: 4, kind: input, shape index: {}]   ;;  %s942_s5 = inlined_call_operand.vmem [shape: f32[4,1], index: 5, kind: input, shape index: {}]   ;;  %s943_s6 = inlined_call_operand.vmem [shape: f32[4,1], index: 6, kind: input, shape index: {}]   ;;  %s944_s7 = inlined_call_operand.vmem [shape: f32[2,4,256], index: 7, kind: output, shape index: {}]  }
   0x1   :  { %s876_s26 = smov 0  }
   0x2 LB: > { %s29_s27 = sadd.s32 1, %s824_s25  ;;  %p746_p0 = scmp.ge.s32.totalorder %s828_s26, 1  ;;  %s828_s26 = sphi %s876_s26, %s17_s26   ;;  %s824_s25 = sphi %s874_s25, %s946_s25   ;;  %s820_s24 = sphi %s872_s24, %s945_s24  }
   0x3   : > { %p31_p1 = scmp.ge.s32.totalorder %s29_s27, 2  ;;  %p275_p2 = scmp.lt.s32.totalorder %s828_s26, 3 }
   0x5   : > { %s948_s27 = smov (%p31_p1, %s29_s27), 0  ;;  %p276_p3 = pnand %p746_p0, %p275_p2 }
   0x6   : > { %p325_p4 = scmp.lt.s32.totalorder (!%p276_p3), %s820_s24, 1 }
   0x7   : > { %279 = sbr.rel (%p276_p3) target bundleno = 458 (0x1ca), region = 48 }
   0xc   : > { %v830_v0 = vmov 0.0   ;;  %v520_v1 = vld [vmem:[%s942_s5] sm:$0xf]  ;;  %s950_s24 = smov (!%p325_p4, %s820_s24), 1  ;;  %v831_v2 = vmov 0   ;;  %vm364_vm0 = vcmask 1043456  }
   0xd   : > { %433 = vmatprep.mubr.f32.mxu0 %v830_v0  ;;  %513 = vmatprep.mubr.f32.mxu1 %v830_v0  ;;  %s893_s30 = sshll.u32 %s950_s24, 3  ;;  %v531_v3 = vld [vmem:[%s943_s6] sm:$0xf]  ;;  %vm360_vm1 = vcmask 31744  }
   0xe   : > { %795 = vset.pattern.permute.xlu0 %v831_v2  ;;  %s342_s12 = scalar_lea.vmem %s938_s1, %s893_s30  ;;  %s332_s15 = scalar_lea.vmem %s937_s0, %s893_s30  ;;  %v357_v8 = vld [vmem:[%s940_s3] sm:$0xf] }
   0xf   : > { %523 = vperm.xlu0 %795, %v520_v1   ;;  %v355_v4 = vld [vmem:[%s342_s12] sm:$0xff]  ;;  %s352_s24 = scalar_lea.vmem %s944_s7, %s893_s30 }
  0x10   : > { %v359_v5 = vcombine.high %v355_v4, %v355_v4  ;;  %v354_v6 = vld [vmem:[%s332_s15] sm:$0xff] }
  0x11   : > { %v441_v7 = vcombine.high %v354_v6, %v354_v6  ;;  %v356_v9 = vld [vmem:[%s939_s2] sm:$0xf] }
  0x12   : > { %753 = vmatprep.subr.msk.mxu0 %vm364_vm0, %v359_v5  ;;  %v530_v21 = vld [vmem:[%s941_s4] sm:$0xf] }
  0x13   : > { %534 = vperm.xlu0 %795, %v531_v3   ;;  %756 = vmatprep.subr.msk.mxu1 %vm364_vm0, %v441_v7 }
  0x14   : > { %754 = vmatpush1.msk.msra.mxu0 %vm364_vm0, %v355_v4  ;;  %757 = vmatpush1.msk.msra.mxu1 %vm364_vm0, %v354_v6 }
  0x15   : > { %755 = vmatmul.mubr.msk.f32.vlgmr.msra.gmra.mxu0 %vm360_vm1, %v357_v8  ;;  %758 = vmatmul.mubr.msk.f32.vlgmr.msra.gmra.mxu1 %vm360_vm1, %v356_v9 }
  0x16   : > { %610 = vmatprep.mubr.f32.mxu0 %v830_v0 }
  0x8a   : > { %v524_v15 = vpop.permute.xlu0 %523 }
  0x8e   : > { %v535_v22 = vpop.permute.xlu0 %534 }
  0xd5   : > { %v435_v10 = vpop.f32.mrf.mxu0  ;;  %v515_v11 = vpop.f32.mrf.mxu1 }
  0xd6   : > { %v516_v12 = vadd.f32 %v515_v11, %v435_v10 }
  0xd7   : > { %v437_v13 = vpop.f32.mrf.mxu0  ;;  %v517_v14 = vpop.f32.mrf.mxu1 }
  0xd8   : > { %v518_v16 = vadd.f32 %v517_v14, %v437_v13  ;;  %v526_v17 = vadd.f32 %v524_v15, %v516_v12 }
  0xda   : > { %v527_v18 = vadd.f32 %v524_v15, %v518_v16  ;;  %v528_v20 = vmax.f32 %v526_v17, 0.0 }
  0xdc   : > { %v529_v19 = vmax.f32 %v527_v18, 0.0 }
  0xde   : > { %759 = vmatprep.subr.msk.mxu0 %vm364_vm0, %v529_v19 }
  0xdf   : > { %760 = vmatpush1.msk.msra.mxu0 %vm364_vm0, %v528_v20 }
  0xe0   : > { %761 = vmatmul.mubr.msk.f32.vlgmr.msra.gmra.mxu0 %vm360_vm1, %v530_v21 }
 0x1a0   : > { %v612_v23 = vpop.f32.mrf.mxu0 }
 0x1a1   : > { %v613_v24 = vadd.f32 %v612_v23, %v535_v22 }
 0x1a2   : > { %v614_v25 = vpop.f32.mrf.mxu0 }
 0x1a3   : > { %v762_v26 = vmul.f32 -1.442695, %v613_v24  ;;  %v615_v27 = vadd.f32 %v614_v25, %v535_v22 }
 0x1a5   : > { %798 = vpow2.f32 %v762_v26  ;;  %v763_v28 = vmul.f32 -1.442695, %v615_v27 }
 0x1a7   : > { %800 = vpow2.f32 %v763_v28 }
 0x1b2   : > { %v799_v29 = vpop.eup %798 }
 0x1b3   : > { %v623_v30 = vadd.f32 1.0, %v799_v29 }
 0x1b4   : > { %v801_v31 = vpop.eup %800 }
 0x1b5   : > { %802 = vrcp.f32 %v623_v30  ;;  %v624_v32 = vadd.f32 1.0, %v801_v31 }
 0x1b7   : > { %804 = vrcp.f32 %v624_v32 }
 0x1c2   : > { %v803_v33 = vpop.eup %802 }
 0x1c3   : > { %v630_v35 = vmul.f32 %v803_v33, %v355_v4 }
 0x1c4   : > { %v805_v34 = vpop.eup %804 }
 0x1c5   : > { %v631_v36 = vmul.f32 %v805_v34, %v359_v5 }
 0x1c7   : > { %v634_v37 = vcombine.low %v630_v35, %v631_v36 }
 0x1c9   : > { %636 = vst [vmem:[%s352_s24] sm:$0xff] %v634_v37 }
 0x1ca PF: > { %s17_s26 = sadd.s32 1, %s828_s26   ;;  %s945_s24 = smov %s824_s25 }
 0x1cb   : > { %p14_p5 = scmp.ge.s32.totalorder %s17_s26, 4   ;;  %s946_s25 = smov %s948_s27 }
 0x1cd   :  { %16 = sbr.rel (!%p14_p5) target bundleno = 2 (0x2), region = 81 }

</bundles_post_ra>
